<compile_context>
chip_gen: v7x
topology: tpu7x:2x2x1
jax: 0.10.0
libtpu: 0.0.40
codegen_flags: <defaults>
</compile_context>

<pallas_src>
import math

import jax
import jax.numpy as jnp
from jax.experimental import pallas as pl
from jax.experimental.pallas import tpu as pltpu


_GELU_C = math.sqrt(2.0 / math.pi)


def _mlp_kernel(x_ref, w1_ref, b1_ref, w2_ref, b2_ref, o_ref, acc_ref):
    # Grid step (i, k):
    #   x_ref  : (TM, E)   row tile, resident across k (constant block index)
    #   w1_ref : (E, TN)   c_fc weight column-block (streamed over k)
    #   b1_ref : (1, TN)   c_fc bias block
    #   w2_ref : (TN, E)   c_proj weight row-block (streamed over k)
    #   b2_ref : (1, E)    c_proj bias (constant)
    #   o_ref  : (TM, E)   output row tile (revisited across k)
    #   acc_ref: (TM, E)   f32 accumulator scratch
    k = pl.program_id(1)

    @pl.when(k == 0)
    def _():
        acc_ref[...] = jnp.zeros_like(acc_ref)

    # c_fc partial: MXU matmul in operand dtype, f32 accumulation.
    h = jnp.dot(x_ref[...], w1_ref[...], preferred_element_type=jnp.float32)
    h = h + b1_ref[...].astype(jnp.float32)

    # gelu (tanh approximation, exactly as the reference) in f32
    # (v5e has no bf16 VPU/EUP; tanh goes to the EUP slot anyway).
    h = 0.5 * h * (1.0 + jnp.tanh(_GELU_C * (h + 0.044715 * h * h * h)))

    # c_proj partial: narrow to the weight dtype only at the MXU boundary.
    acc_ref[...] += jnp.dot(h.astype(w2_ref.dtype), w2_ref[...],
                            preferred_element_type=jnp.float32)

    @pl.when(k == pl.num_programs(1) - 1)
    def _():
        out = acc_ref[...] + b2_ref[...].astype(jnp.float32)
        o_ref[...] = out.astype(o_ref.dtype)
        # TODO(synk): nn.Dropout is identity in eval mode; no RNG dropout.


def _round_up(x, m):
    return ((x + m - 1) // m) * m


def _vmem_capacity_bytes():
    try:
        cap = int(pltpu.get_tpu_info().vmem_capacity_bytes)
        if cap > 0:
            return cap
    except Exception:
        pass
    return 64 * 1024 * 1024        # conservative fallback: v7x per-TensorCore


def _vmem_bytes_estimate(tm, tn, e, in_bytes, w_bytes, out_bytes):
    # Pallas double-buffers every pipelined operand -> count 2 buffers each.
    x_t = 2 * tm * e * in_bytes
    out_t = 2 * tm * e * out_bytes
    w1 = 2 * e * tn * w_bytes
    w2 = 2 * tn * e * w_bytes
    b1 = 2 * 8 * max(tn, 128) * 4          # sublane/lane padded bias blocks
    b2 = 2 * 8 * max(e, 128) * 4
    acc = tm * e * 4                       # f32 accumulator scratch
    hid = 2 * tm * tn * 4                  # f32 hidden temporaries (h, gelu)
    return x_t + out_t + w1 + w2 + b1 + b2 + acc + hid


def _choose_tiles(M, E, n_state, in_bytes, w_bytes, out_bytes, budget):
    # TN: a multiple-of-128 divisor of n_state, so the reduction axis never
    # has a ragged block (padding garbage inside a reduction would corrupt
    # the accumulated sum).
    if n_state % 128 == 0:
        d = n_state // 128
        tn_cands = sorted({128 * f for f in range(1, d + 1)
                           if d % f == 0 and 128 * f <= 2048},
                          reverse=True)
    else:
        tn_cands = [n_state]

    # TM: MXU/sublane-aligned, as large as the VMEM budget allows.
    min_tile = 16 if in_bytes < 4 else 8   # bf16 sublane-packing minimum
    tm_max = max(min_tile, _round_up(M, min_tile))
    tm_cands = [t for t in (4096, 2048, 1024, 512, 256, 128, 64, 32, 16, 8)
                if min_tile <= t <= tm_max]
    if not tm_cands:
        tm_cands = [tm_max]

    for tm in tm_cands:                    # prefer big row tiles (HBM roofline)
        for tn in tn_cands:                # then the biggest hidden tile
            if _vmem_bytes_estimate(tm, tn, E, in_bytes, w_bytes,
                                    out_bytes) <= budget:
                return tm, tn
    return tm_cands[-1], tn_cands[-1]


def mlp_pallas(x, w_fc, b_fc, w_proj, b_proj, *, mxu_dtype=None,
               tm=None, tn=None, interpret=False):
    """MLP forward: c_proj(gelu(c_fc(x))); dropout is identity (eval mode).

    x: (B, T, E); w_fc: (E, n_state); b_fc: (n_state,);
    w_proj: (n_state, E); b_proj: (E,).
    mxu_dtype: optional dtype (e.g. jnp.bfloat16) to feed the MXU; halves
      activation/weight DMA bytes and unlocks the bf16 MXU rate on v6e/v7x.
    """
    B, T, E = x.shape
    n_state = w_fc.shape[1]
    M = B * T
    out_dtype = x.dtype

    x2d = x.reshape(M, E)
    if mxu_dtype is not None:
        x2d = x2d.astype(mxu_dtype)
        w_fc = w_fc.astype(mxu_dtype)
        w_proj = w_proj.astype(mxu_dtype)

    in_bytes = jnp.dtype(x2d.dtype).itemsize
    w_bytes = jnp.dtype(w_fc.dtype).itemsize
    out_bytes = jnp.dtype(out_dtype).itemsize

    # Per-generation VMEM budget: ~85% of physical, minus a small margin for
    # compiler-internal scratch (v7x: ~54 MiB of 64; v5e/v6e: ~109 of 128).
    vmem_limit = int(_vmem_capacity_bytes() * 0.85)
    budget = vmem_limit - (2 << 20)

    auto_tm, auto_tn = _choose_tiles(M, E, n_state, in_bytes, w_bytes,
                                     out_bytes, budget)
    tm = auto_tm if tm is None else tm
    tn = auto_tn if tn is None else tn

    b_fc2 = b_fc.reshape(1, n_state).astype(jnp.float32)
    b_proj2 = b_proj.reshape(1, E).astype(jnp.float32)

    # No host-side padding: the ragged last row-block (if any) is handled by
    # Pallas; rows are independent, so padded lanes never contaminate valid
    # output rows and their write-back is masked.
    grid = (pl.cdiv(M, tm), n_state // tn)

    cost = pl.CostEstimate(
        flops=4 * M * E * n_state,                       # two matmuls
        transcendentals=M * n_state,                     # tanh in gelu
        bytes_accessed=(M * E * (in_bytes + out_bytes)   # x in, y out
                        + grid[0] * 2 * E * n_state * w_bytes  # W1+W2 re-read
                        + (n_state + E) * 4),            # biases
    )

    # NOTE: at toy E < 128 the output block is not lane-dense (masked vst);
    # real transformer E (multiple of 128) already is, so no row->lane fold.
    out2d = pl.pallas_call(
        _mlp_kernel,
        out_shape=jax.ShapeDtypeStruct((M, E), out_dtype),
        grid_spec=pltpu.PrefetchScalarGridSpec(
            num_scalar_prefetch=0,
            grid=grid,
            in_specs=[
                pl.BlockSpec((tm, E), lambda i, k: (i, 0)),   # x rows (resident over k)
                pl.BlockSpec((E, tn), lambda i, k: (0, k)),   # W1 column-block
                pl.BlockSpec((1, tn), lambda i, k: (0, k)),   # b1 block
                pl.BlockSpec((tn, E), lambda i, k: (k, 0)),   # W2 row-block
                pl.BlockSpec((1, E), lambda i, k: (0, 0)),    # b2 (constant)
            ],
            out_specs=pl.BlockSpec((tm, E), lambda i, k: (i, 0)),
            scratch_shapes=[pltpu.VMEM((tm, E), jnp.float32)],
        ),
        compiler_params=pltpu.CompilerParams(
            dimension_semantics=("parallel", "arbitrary"),
            vmem_limit_bytes=vmem_limit,
        ),
        cost_estimate=cost,
        interpret=interpret,
    )(x2d, w_fc, b_fc2, w_proj, b_proj2)

    return out2d.reshape(B, T, E)


def _reference_mlp(x, w_fc, b_fc, w_proj, b_proj):
    h = jnp.einsum("bte,ef->btf", x, w_fc) + b_fc
    h = 0.5 * h * (1.0 + jnp.tanh(_GELU_C * (h + 0.044715 * h ** 3)))
    return jnp.einsum("btf,fe->bte", h, w_proj) + b_proj


if __name__ == "__main__":
    # Config: n_embd = 32, n_state = 4 * n_embd = 128 (typical MLP ratio).
    n_embd = 32
    n_state = 4 * n_embd
    B, T = 2, 8

    key = jax.random.PRNGKey(0)
    kx, k1, k2, k3, k4, kx2 = jax.random.split(key, 6)

    x = jax.random.normal(kx, (B, T, n_embd), dtype=jnp.float32)
    # Conv1D weights: normal(std=0.02); use small nonzero biases so the bias
    # path is actually exercised by the check.
    w_fc = 0.02 * jax.random.normal(k1, (n_embd, n_state), dtype=jnp.float32)
    b_fc = 0.01 * jax.random.normal(k3, (n_state,), dtype=jnp.float32)
    w_proj = 0.02 * jax.random.normal(k2, (n_state, n_embd), dtype=jnp.float32)
    b_proj = 0.01 * jax.random.normal(k4, (n_embd,), dtype=jnp.float32)

    # 1) f32 path, evenly divisible M.
    out = jax.block_until_ready(mlp_pallas(x, w_fc, b_fc, w_proj, b_proj))
    ref = _reference_mlp(x, w_fc, b_fc, w_proj, b_proj)
    assert out.shape == (B, T, n_embd)
    assert jnp.allclose(out, ref, atol=1e-5, rtol=1e-5), "f32 mismatch"

    # 2) f32 path, ragged M (exercises the no-pad boundary block).
    x_r = jax.random.normal(kx2, (B, 7, n_embd), dtype=jnp.float32)
    out_r = jax.block_until_ready(mlp_pallas(x_r, w_fc, b_fc, w_proj, b_proj))
    ref_r = _reference_mlp(x_r, w_fc, b_fc, w_proj, b_proj)
    assert jnp.allclose(out_r, ref_r, atol=1e-5, rtol=1e-5), "ragged mismatch"

    # 3) bf16 MXU feed (f32 accumulation); looser tolerance vs f32 reference.
    out_bf = jax.block_until_ready(
        mlp_pallas(x, w_fc, b_fc, w_proj, b_proj, mxu_dtype=jnp.bfloat16))
    assert jnp.allclose(out_bf, ref, atol=3e-2, rtol=3e-2), "bf16 mismatch"

    print("KERNEL_OK")
</pallas_src>

<mosaic_0001>
module attributes {stable_mosaic.version = 11 : i64} {
  func.func @_mlp_kernel(%arg0: i32, %arg1: i32, %arg2: memref<16x32xf32, #tpu.memory_space<vmem>>, %arg3: memref<32x128xf32, #tpu.memory_space<vmem>>, %arg4: memref<1x128xf32, #tpu.memory_space<vmem>>, %arg5: memref<128x32xf32, #tpu.memory_space<vmem>>, %arg6: memref<1x32xf32, #tpu.memory_space<vmem>>, %arg7: memref<16x32xf32, #tpu.memory_space<vmem>>, %arg8: memref<16x32xf32, #tpu.memory_space<vmem>>) attributes {dimension_semantics = [#tpu.dimension_semantics<parallel>, #tpu.dimension_semantics<arbitrary>], iteration_bounds = array<i64: 1, 1>, scalar_prefetch = 0 : i64, scratch_operands = 1 : i64, tpu.core_type = #tpu.core_type<tc>, window_params = [{transform_indices = @transform_0, window_bounds = array<i64: 16, 32>}, {transform_indices = @transform_1, window_bounds = array<i64: 32, 128>}, {transform_indices = @transform_2, window_bounds = array<i64: 1, 128>}, {transform_indices = @transform_3, window_bounds = array<i64: 128, 32>}, {pipeline_mode = #tpu.pipeline_mode<synchronous>, transform_indices = @transform_4, window_bounds = array<i64: 1, 32>}, {transform_indices = @transform_5, window_bounds = array<i64: 16, 32>}]} {
    %c0_i32 = arith.constant 0 : i32
    %0 = arith.cmpi eq, %arg1, %c0_i32 : i32
    %1 = arith.extui %0 : i1 to i32
    %c0_i32_0 = arith.constant 0 : i32
    %2 = arith.cmpi ne, %1, %c0_i32_0 : i32
    scf.if %2 {
      %cst_19 = arith.constant 0.000000e+00 : f32
      %30 = vector.broadcast %cst_19 : f32 to vector<16x32xf32>
      %c0_20 = arith.constant 0 : index
      %c0_21 = arith.constant 0 : index
      %31 = vector.load %arg8[%c0_20, %c0_21] : memref<16x32xf32, #tpu.memory_space<vmem>>, vector<16x32xf32>
      tpu.vector_store %arg8[%c0_20, %c0_21], %30 {strides = array<i32>} : memref<16x32xf32, #tpu.memory_space<vmem>>, vector<16x32xf32>,
    } else {
    }
    %c0 = arith.constant 0 : index
    %c0_1 = arith.constant 0 : index
    %3 = vector.load %arg2[%c0, %c0_1] : memref<16x32xf32, #tpu.memory_space<vmem>>, vector<16x32xf32>
    %c0_2 = arith.constant 0 : index
    %c0_3 = arith.constant 0 : index
    %4 = vector.load %arg3[%c0_2, %c0_3] : memref<32x128xf32, #tpu.memory_space<vmem>>, vector<32x128xf32>
    %cst = arith.constant dense<0.000000e+00> : vector<16x128xf32>
    %5 = tpu.matmul %3, %4, %cst {dimension_numbers = #tpu.dot_dimension_numbers<[1], [0], [0], [1], [0, 0, 1, 1], [], []>} : vector<16x32xf32>, vector<32x128xf32>, vector<16x128xf32> -> vector<16x128xf32>
    %c0_4 = arith.constant 0 : index
    %c0_5 = arith.constant 0 : index
    %6 = vector.load %arg4[%c0_4, %c0_5] : memref<1x128xf32, #tpu.memory_space<vmem>>, vector<1x128xf32>
    %7 = vector.broadcast %6 : vector<1x128xf32> to vector<16x128xf32>
    %8 = arith.addf %5, %7 : vector<16x128xf32>
    %cst_6 = arith.constant 5.000000e-01 : f32
    %9 = vector.broadcast %cst_6 : f32 to vector<16x128xf32>
    %10 = arith.mulf %9, %8 : vector<16x128xf32>
    %cst_7 = arith.constant 4.471500e-02 : f32
    %11 = vector.broadcast %cst_7 : f32 to vector<16x128xf32>
    %12 = arith.mulf %11, %8 : vector<16x128xf32>
    %13 = arith.mulf %12, %8 : vector<16x128xf32>
    %14 = arith.mulf %13, %8 : vector<16x128xf32>
    %15 = arith.addf %8, %14 : vector<16x128xf32>
    %cst_8 = arith.constant 0.797884583 : f32
    %16 = vector.broadcast %cst_8 : f32 to vector<16x128xf32>
    %17 = arith.mulf %16, %15 : vector<16x128xf32>
    %18 = math.tanh %17 : vector<16x128xf32>
    %cst_9 = arith.constant 1.000000e+00 : f32
    %19 = vector.broadcast %cst_9 : f32 to vector<16x128xf32>
    %20 = arith.addf %19, %18 : vector<16x128xf32>
    %21 = arith.mulf %10, %20 : vector<16x128xf32>
    %c0_10 = arith.constant 0 : index
    %c0_11 = arith.constant 0 : index
    %22 = vector.load %arg8[%c0_10, %c0_11] : memref<16x32xf32, #tpu.memory_space<vmem>>, vector<16x32xf32>
    %c0_12 = arith.constant 0 : index
    %c0_13 = arith.constant 0 : index
    %23 = vector.load %arg5[%c0_12, %c0_13] : memref<128x32xf32, #tpu.memory_space<vmem>>, vector<128x32xf32>
    %cst_14 = arith.constant dense<0.000000e+00> : vector<16x32xf32>
    %24 = tpu.matmul %21, %23, %cst_14 {dimension_numbers = #tpu.dot_dimension_numbers<[1], [0], [0], [1], [0, 0, 1, 1], [], []>} : vector<16x128xf32>, vector<128x32xf32>, vector<16x32xf32> -> vector<16x32xf32>
    %25 = arith.addf %22, %24 : vector<16x32xf32>
    %c0_15 = arith.constant 0 : index
    %c0_16 = arith.constant 0 : index
    %26 = vector.load %arg8[%c0_15, %c0_16] : memref<16x32xf32, #tpu.memory_space<vmem>>, vector<16x32xf32>
    tpu.vector_store %arg8[%c0_15, %c0_16], %25 {strides = array<i32>} : memref<16x32xf32, #tpu.memory_space<vmem>>, vector<16x32xf32>,
    %c0_i32_17 = arith.constant 0 : i32
    %27 = arith.cmpi eq, %arg1, %c0_i32_17 : i32
    %28 = arith.extui %27 : i1 to i32
    %c0_i32_18 = arith.constant 0 : i32
    %29 = arith.cmpi ne, %28, %c0_i32_18 : i32
    scf.if %29 {
      %c0_19 = arith.constant 0 : index
      %c0_20 = arith.constant 0 : index
      %30 = vector.load %arg8[%c0_19, %c0_20] : memref<16x32xf32, #tpu.memory_space<vmem>>, vector<16x32xf32>
      %c0_21 = arith.constant 0 : index
      %c0_22 = arith.constant 0 : index
      %31 = vector.load %arg6[%c0_21, %c0_22] : memref<1x32xf32, #tpu.memory_space<vmem>>, vector<1x32xf32>
      %32 = vector.broadcast %31 : vector<1x32xf32> to vector<16x32xf32>
      %33 = arith.addf %30, %32 : vector<16x32xf32>
      %c0_23 = arith.constant 0 : index
      %c0_24 = arith.constant 0 : index
      %34 = vector.load %arg7[%c0_23, %c0_24] : memref<16x32xf32, #tpu.memory_space<vmem>>, vector<16x32xf32>
      tpu.vector_store %arg7[%c0_23, %c0_24], %33 {strides = array<i32>} : memref<16x32xf32, #tpu.memory_space<vmem>>, vector<16x32xf32>,
    } else {
    }
    return
  }
  func.func @transform_0(%arg0: i32, %arg1: i32) -> (i32, i32) {
    %c0_i32 = arith.constant 0 : i32
    %c0_i32_0 = arith.constant 0 : i32
    return %arg0, %c0_i32 : i32, i32
  }
  func.func @transform_1(%arg0: i32, %arg1: i32) -> (i32, i32) {
    %c0_i32 = arith.constant 0 : i32
    %c0_i32_0 = arith.constant 0 : i32
    return %c0_i32, %arg1 : i32, i32
  }
  func.func @transform_2(%arg0: i32, %arg1: i32) -> (i32, i32) {
    %c0_i32 = arith.constant 0 : i32
    %c0_i32_0 = arith.constant 0 : i32
    return %c0_i32, %arg1 : i32, i32
  }
  func.func @transform_3(%arg0: i32, %arg1: i32) -> (i32, i32) {
    %c0_i32 = arith.constant 0 : i32
    %c0_i32_0 = arith.constant 0 : i32
    return %arg1, %c0_i32 : i32, i32
  }
  func.func @transform_4(%arg0: i32, %arg1: i32) -> (i32, i32) {
    %c0_i32 = arith.constant 0 : i32
    %c0_i32_0 = arith.constant 0 : i32
    %c0_i32_1 = arith.constant 0 : i32
    return %c0_i32, %c0_i32_0 : i32, i32
  }
  func.func @transform_5(%arg0: i32, %arg1: i32) -> (i32, i32) {
    %c0_i32 = arith.constant 0 : i32
    %c0_i32_0 = arith.constant 0 : i32
    return %arg0, %c0_i32 : i32, i32
  }
}

</mosaic_0001>

<bundles_post_ra>
// kernel: tpu_custom_call.1
= control target key start
LH: loop header
LB: loop body
LE: loop exit
PB: predicated region body
PF: predicated region fallthrough
CT: control target
= control target key end

     0   :  { %vm25_vm0 = vcmask 261120   ;;  %s542_s0 = inlined_call_operand.vmem [shape: f32[16,32], index: 0, kind: input, shape index: {}]   ;;  %s543_s1 = inlined_call_operand.vmem [shape: f32[32,128], index: 1, kind: input, shape index: {}]   ;;  %s544_s2 = inlined_call_operand.vmem [shape: f32[1,128], index: 2, kind: input, shape index: {}]   ;;  %s545_s3 = inlined_call_operand.vmem [shape: f32[128,32], index: 3, kind: input, shape index: {}]   ;;  %s546_s4 = inlined_call_operand.vmem [shape: f32[1,32], index: 4, kind: input, shape index: {}]   ;;  %s547_s5 = inlined_call_operand.hbm [shape: f32[16,32], index: 5, kind: output, shape index: {}]  }
   0x1   :  { %v30_v0 = vld [vmem:[%s543_s1] sm:$0xff]  ;;  %v31_v1 = vld [vmem:[%s543_s1 + $0x8] sm:$0xff]  ;;  %v32_v2 = vld [vmem:[%s543_s1 + $0x10] sm:$0xff] }
   0x2   :  { %v344_v3 = vpack.c.bf16 %v31_v1, %v30_v0  ;;  %v33_v4 = vld [vmem:[%s543_s1 + $0x18] sm:$0xff]  ;;  %v28_v5 = vld [vmem:[%s542_s0] sm:$0xff]  ;;  %v144_v8 = vld [vmem:[%s545_s3 + $0x8] sm:$0xff] }
   0x3   :  { %v348_v6 = vpack.c.bf16 %v33_v4, %v32_v2  ;;  %306 = vmatprep.mubr.msk.f32.mxu0 %vm25_vm0, %v28_v5  ;;  %v143_v7 = vld [vmem:[%s545_s3] sm:$0xff] }
   0x4   :  { %10 = vsyncpa [#allocation4], 0  ;;  %345 = vmatprep.subr.bf16.mxu0 %v344_v3  ;;  %v352_v9 = vpack.c.bf16 %v144_v8, %v143_v7  ;;  %v29_v10 = vld [vmem:[%s542_s0 + $0x8] sm:$0xff]  ;;  %v145_v11 = vld [vmem:[%s545_s3 + $0x10] sm:$0xff]  ;;  %v416_v32 = vmov 0.0   ;;  %s417_s11 = smov [#allocation3]  }
   0x5   :  { %347 = vmatpush3.bf16.msra.mxu0 %v344_v3  ;;  %v146_v12 = vld [vmem:[%s545_s3 + $0x18] sm:$0xff]  ;;  %v147_v14 = vld [vmem:[%s545_s3 + $0x20] sm:$0xff]  ;;  %v148_v15 = vld [vmem:[%s545_s3 + $0x28] sm:$0xff]  ;;  %27 = vst.msk [vmem:[#allocation2 + $0x8] sm:$0xff] %vm25_vm0, %v416_v32  ;;  %s259_s12 = sshll.u32 %s417_s11, 4  ;;  %s260_s12 = int_to_ptr.vmem [resolvable:$true] %s259_s12 }
   0x6   :  { %349 = vmatprep.subr.bf16.mxu0 %v348_v6  ;;  %353 = vmatprep.subr.bf16.mxu1 %v352_v9  ;;  %v356_v13 = vpack.c.bf16 %v146_v12, %v145_v11  ;;  %v360_v16 = vpack.c.bf16 %v148_v15, %v147_v14  ;;  %v149_v17 = vld [vmem:[%s545_s3 + $0x30] sm:$0xff]  ;;  %v150_v18 = vld [vmem:[%s545_s3 + $0x38] sm:$0xff]  ;;  %v151_v19 = vld [vmem:[%s545_s3 + $0x40] sm:$0xff]  ;;  %26 = vst.msk [vmem:[#allocation2] sm:$0xff] %vm25_vm0, %v416_v32  ;;  %s392_s13 = scalar_lea.vmem %s260_s12, 256  ;;  %p397_p1 = scmp.lt.s32.totalorder %s260_s12, %s260_s12 }
   0x7   :  { %355 = vmatpush3.bf16.msra.mxu1 %v352_v9  ;;  %v364_v20 = vpack.c.bf16 %v150_v18, %v149_v17  ;;  %v152_v21 = vld [vmem:[%s545_s3 + $0x48] sm:$0xff]  ;;  %v153_v23 = vld [vmem:[%s545_s3 + $0x50] sm:$0xff]  ;;  %v154_v24 = vld [vmem:[%s545_s3 + $0x58] sm:$0xff]  ;;  %p393_p0 = scmp.ne.s32.totalorder %s260_s12, %s392_s13  ;;  %p398_p2 = scmp.lt.s32.totalorder %s392_s13, %s392_s13 }
   0x8   :  { %357 = vmatprep.subr.bf16.mxu1 %v356_v13  ;;  %v368_v22 = vpack.c.bf16 %v152_v21, %v151_v19  ;;  %v372_v25 = vpack.c.bf16 %v154_v24, %v153_v23  ;;  %v155_v26 = vld [vmem:[%s545_s3 + $0x60] sm:$0xff]  ;;  %v156_v27 = vld [vmem:[%s545_s3 + $0x68] sm:$0xff]  ;;  %v157_v29 = vld [vmem:[%s545_s3 + $0x70] sm:$0xff] }
   0x9   :  { %351 = vmatpush3.bf16.msra.mxu0 %v348_v6  ;;  %v376_v28 = vpack.c.bf16 %v156_v27, %v155_v26  ;;  %v158_v30 = vld [vmem:[%s545_s3 + $0x78] sm:$0xff]  ;;  %v270_v33 = vld [vmem:[%s544_s2] ss:$0 sm:$0xff]  ;;  %p399_p3 = por %p398_p2, %p397_p1 }
   0xa   :  { %v380_v31 = vpack.c.bf16 %v158_v30, %v157_v29  ;;  %v273_v62 = vld [vmem:[%s546_s4] ss:$0 sm:$0xff] }
   0xb   :  { %359 = vmatpush3.bf16.msra.mxu1 %v356_v13  ;;  %p400_p4 = pnand %p399_p3, %p393_p0 }
   0xc   :  { %307 = vmatmul.mubr.msk.f32.vlgmr.msra.gmra.mrb[0].mxu0 %vm25_vm0, %v29_v10  ;;  %361 = vmatprep.subr.bf16.mxu1 %v360_v16  ;;  %v142_v56 = vld [vmem:[#allocation2 + $0x8] sm:$0xff] }
   0xd   :  { %v141_v57 = vld [vmem:[#allocation2] sm:$0xff] }
   0xf   :  { %363 = vmatpush3.bf16.msra.mxu1 %v360_v16 }
  0x10   :  { %365 = vmatprep.subr.bf16.mxu1 %v364_v20 }
  0x13   :  { %367 = vmatpush3.bf16.msra.mxu1 %v364_v20 }
  0x14   :  { %369 = vmatprep.subr.bf16.mxu1 %v368_v22 }
  0x17   :  { %371 = vmatpush3.bf16.msra.mxu1 %v368_v22 }
  0x18   :  { %373 = vmatprep.subr.bf16.mxu1 %v372_v25 }
  0x1b   :  { %375 = vmatpush3.bf16.msra.mxu1 %v372_v25 }
  0x1c   :  { %377 = vmatprep.subr.bf16.mxu1 %v376_v28 }
  0x1f   :  { %379 = vmatpush3.bf16.msra.mxu1 %v376_v28 }
  0x20   :  { %381 = vmatprep.subr.bf16.mxu1 %v380_v31 }
  0x23   :  { %383 = vmatpush3.bf16.msra.mxu1 %v380_v31 }
  0xdf   :  { %v308_v34 = vpop.f32.mrb[0].mxu0 }
  0xe0   :  { %v120_v35 = vadd.f32 %v308_v34, %v270_v33  ;;  %v114_v36 = vpop.f32.mrb[1].mxu0 }
  0xe1   :  { %v115_v37 = vadd.f32 %v270_v33, %v114_v36 }
  0xe2   :  { %v126_v38 = vmul.f32 0.044715, %v120_v35  ;;  %v124_v53 = vmul.f32 0.5, %v120_v35 }
  0xe3   :  { %v125_v39 = vmul.f32 0.044715, %v115_v37  ;;  %v123_v51 = vmul.f32 0.5, %v115_v37 }
  0xe4   :  { %v128_v40 = vmul.f32 %v126_v38, %v120_v35 }
  0xe5   :  { %v127_v41 = vmul.f32 %v125_v39, %v115_v37 }
  0xe6   :  { %v130_v42 = vmul.f32 %v128_v40, %v120_v35 }
  0xe7   :  { %v129_v43 = vmul.f32 %v127_v41, %v115_v37 }
  0xe8   :  { %v132_v44 = vadd.f32 %v130_v42, %v120_v35 }
  0xe9   :  { %v131_v45 = vadd.f32 %v129_v43, %v115_v37 }
  0xea   :  { %v134_v46 = vmul.f32 0.7978846, %v132_v44 }
  0xeb   :  { %v133_v47 = vmul.f32 0.7978846, %v131_v45 }
  0xec   :  { %388 = vtanh.f32 %v134_v46 }
  0xed   :  { %390 = vtanh.f32 %v133_v47 }
  0xf6   :  { %v389_v48 = vpop.eup %388 }
  0xf7   :  { %v391_v49 = vpop.eup %390  ;;  %v138_v50 = vadd.f32 1.0, %v389_v48 }
  0xf8   :  { %v137_v52 = vadd.f32 1.0, %v391_v49 }
  0xf9   :  { %v140_v55 = vmul.f32 %v138_v50, %v124_v53 }
  0xfa   :  { %v139_v54 = vmul.f32 %v137_v52, %v123_v51 }
  0xfc   :  { %341 = vmatprep.mubr.f32.mxu1 %v139_v54 }
  0xfd   :  { %342 = vmatmul.mubr.f32.vlgmr.msra.gmra.mrb[0].mxu1 %v140_v55 }
 0x1d0   :  { %v343_v58 = vpop.f32.mrb[0].mxu1 }
 0x1d1   :  { %v235_v59 = vadd.f32 %v343_v58, %v142_v56  ;;  %v225_v60 = vpop.f32.mrb[1].mxu1 }
 0x1d2   :  { %v234_v61 = vadd.f32 %v225_v60, %v141_v57 }
 0x1d3   :  { %237 = vst.msk [vmem:[#allocation2 + $0x8] sm:$0xff] %vm25_vm0, %v235_v59 }
 0x1d4   :  { %236 = vst.msk [vmem:[#allocation2] sm:$0xff] %vm25_vm0, %v234_v61 }
 0x1da   :  { %v242_v63 = vld [vmem:[#allocation2 + $0x8] sm:$0xff] }
 0x1db   :  { %v241_v0 = vld [vmem:[#allocation2] sm:$0xff]  ;;  %v251_v1 = vadd.f32 %v273_v62, %v242_v63 }
 0x1dc   :  { %v250_v2 = vadd.f32 %v273_v62, %v241_v0 }
 0x1dd   :  { %253 = vst.msk [vmem:[#allocation3 + $0x8] sm:$0xff] %vm25_vm0, %v251_v1 }
 0x1de   :  { %252 = vst.msk [vmem:[#allocation3] sm:$0xff] %vm25_vm0, %v250_v2 }
 0x1df   :  { %403 = shalt.err (!%p400_p4)
}
 0x1e0   :  { %s404_s15 = scalar_lea.hbm %s547_s5, 256 }
 0x1e1   :  { %p405_p5 = scmp.ne.s32.totalorder %s547_s5, %s404_s15  ;;  %p408_p6 = scmp.lt.u32.totalorder %s404_s15, %s547_s5 }
 0x1e3   :  { %p410_p7 = pnand %p408_p6, %p405_p5 }
 0x1e5   :  { %413 = shalt.err (!%p410_p7)
}
 0x1e6   :  { %s418_s19 = smov 128   ;;  %s419_s20 = smov 8  }
 0x1e7   :  { %265 = dma.vmem_to_hbm [thread:$0]  %s260_s12, 256, %s547_s5, [#allocation4], %s418_s19, %s418_s19, %s419_s20  }
 0x1e8   :  { %414 = dma.done.wait [#allocation4], 256  }
 0x1e9   :  { %415 = vsyncadd [#allocation4], 4294967040 }
 0x1ea   :  { %269 = vsyncpa [#allocation4], 1 }

</bundles_post_ra>
